<compile_context>
chip_gen: v5e
topology: v5e:2x2
jax: 0.10.0
libtpu: 0.0.40
codegen_flags: <defaults>
</compile_context>

<pallas_src>
import functools

import jax
import jax.numpy as jnp
from jax.experimental import pallas as pl
from jax.experimental.pallas import tpu as pltpu


def _round_up(x, m):
    return (x + m - 1) // m * m


def highway_kernel(x_ref, w_ref, b_ref, o_ref):
    """x_ref: (TB, Dp); w_ref: (depth, Dp, 2*Dp); b_ref: (depth, 1, 2*Dp)."""
    depth = w_ref.shape[0]
    dp = x_ref.shape[1]

    h = x_ref[...].astype(jnp.float32)          # running highway state (f32)

    # depth is small & static -> fully unrolled in-kernel loop, static indices.
    for d in range(depth):
        w = w_ref[d]                            # (Dp, 2Dp), bf16
        b = b_ref[d]                            # (1, 2Dp), f32
        # Fused normal|gate matmul on the MXU, f32 accumulation.
        ng = jnp.dot(h.astype(w.dtype), w,
                     preferred_element_type=jnp.float32) + b
        n = jnp.maximum(ng[:, :dp], 0.0)        # relu(normal path)
        g = jax.nn.sigmoid(ng[:, dp:])          # sigmoid(gate path)
        h = h + g * (n - h)                     # n*g + (1-g)*h, 3 VALU ops

    o_ref[...] = h.astype(o_ref.dtype)


@functools.partial(jax.jit, static_argnames=("weight_dtype", "batch_tile"))
def highway_layer(x, wn, bn, wg, bg, *, weight_dtype=jnp.bfloat16,
                  batch_tile=256):
    """x: (B, D); wn/wg: (depth, D, D) in [in, out] layout; bn/bg: (depth, D)."""
    depth, D, D2 = wn.shape
    assert D == D2, "highway cell requires input_size == output_size"
    B = x.shape[0]

    # ---- lane-dense padding of the feature dim ----
    lane = 128
    Dp = _round_up(D, lane)
    pad_w = ((0, 0), (0, Dp - D), (0, Dp - D))
    pad_b = ((0, 0), (0, Dp - D))

    # Fuse normal|gate along the output axis; cast weights to bf16.
    wcat = jnp.concatenate(
        [jnp.pad(wn, pad_w), jnp.pad(wg, pad_w)], axis=-1
    ).astype(weight_dtype)                                   # (depth, Dp, 2Dp)
    bcat = jnp.concatenate(
        [jnp.pad(bn, pad_b), jnp.pad(bg, pad_b)], axis=-1
    ).astype(jnp.float32)[:, None, :]                        # (depth, 1, 2Dp)

    # ---- batch tiling (parallel grid axis; sublane-aligned) ----
    bp8 = _round_up(B, 8)
    tb = _round_up(min(batch_tile, bp8), 8)
    Bp = _round_up(bp8, tb)
    x_p = jnp.pad(x, ((0, Bp - B), (0, Dp - D)))             # (Bp, Dp)

    out = pl.pallas_call(
        highway_kernel,
        out_shape=jax.ShapeDtypeStruct((Bp, Dp), x.dtype),
        grid_spec=pltpu.PrefetchScalarGridSpec(
            num_scalar_prefetch=0,
            grid=(Bp // tb,),
            in_specs=[
                pl.BlockSpec((tb, Dp), lambda i: (i, 0)),          # x tile
                pl.BlockSpec((depth, Dp, 2 * Dp), lambda i: (0, 0, 0)),  # all W
                pl.BlockSpec((depth, 1, 2 * Dp), lambda i: (0, 0, 0)),   # all b
            ],
            out_specs=pl.BlockSpec((tb, Dp), lambda i: (i, 0)),
        ),
        compiler_params=pltpu.CompilerParams(
            dimension_semantics=("parallel",),   # batch tiles are independent
        ),
    )(x_p, wcat, bcat)

    return out[:B, :D]


def highway_reference(x, wn, bn, wg, bg):
    """Pure-f32 reference mirroring the PyTorch module exactly."""
    h = x.astype(jnp.float32)
    for d in range(wn.shape[0]):
        n = jax.nn.relu(h @ wn[d] + bn[d])
        g = jax.nn.sigmoid(h @ wg[d] + bg[d])
        h = n * g + (1.0 - g) * h
    return h.astype(x.dtype)


def highway_reference_bf16(x, wn, bn, wg, bg, weight_dtype=jnp.bfloat16):
    """Reference with the same bf16-input / f32-accumulate math as the kernel."""
    h = x.astype(jnp.float32)
    for d in range(wn.shape[0]):
        hq = h.astype(weight_dtype)
        n = jax.nn.relu(
            jnp.dot(hq, wn[d].astype(weight_dtype),
                    preferred_element_type=jnp.float32) + bn[d])
        g = jax.nn.sigmoid(
            jnp.dot(hq, wg[d].astype(weight_dtype),
                    preferred_element_type=jnp.float32) + bg[d])
        h = h + g * (n - h)
    return h.astype(x.dtype)


if __name__ == "__main__":
    depth = 3
    batch = 8
    input_size = output_size = 32   # highway requires input_size == output_size
    gate_bias = 0.0

    key = jax.random.PRNGKey(0)
    kx, kwn, kbn, kwg = jax.random.split(key, 4)

    x = jax.random.normal(kx, (batch, input_size), dtype=jnp.float32)

    # Deterministic synthetic parameters (nn.Linear-like scale 1/sqrt(in)),
    # stored as [in, out] (transpose of torch's [out, in]) for x @ W.
    scale = 1.0 / jnp.sqrt(jnp.float32(input_size))
    wn = jax.random.uniform(kwn, (depth, input_size, output_size),
                            minval=-scale, maxval=scale, dtype=jnp.float32)
    bn = jax.random.uniform(kbn, (depth, output_size),
                            minval=-scale, maxval=scale, dtype=jnp.float32)
    wg = jax.random.uniform(kwg, (depth, input_size, output_size),
                            minval=-scale, maxval=scale, dtype=jnp.float32)
    bg = jnp.full((depth, output_size), gate_bias, dtype=jnp.float32)  # gate bias

    out = highway_layer(x, wn, bn, wg, bg)
    out = jax.block_until_ready(out)
    assert out.shape == (batch, output_size)

    # Tight check vs a reference that mirrors the kernel's bf16/f32 math.
    ref_bf16 = highway_reference_bf16(x, wn, bn, wg, bg)
    assert jnp.allclose(out, ref_bf16, atol=1e-3, rtol=1e-3), \
        "mismatch vs bf16-matched reference"

    # Loose check vs the exact PyTorch (pure f32) semantics: only the bf16
    # quantization of the matmul inputs separates them.
    ref_f32 = highway_reference(x, wn, bn, wg, bg)
    assert jnp.allclose(out, ref_f32, atol=5e-2, rtol=5e-2), \
        "mismatch vs f32 reference"

    print("KERNEL_OK")
</pallas_src>

<mosaic_0001>
module attributes {stable_mosaic.version = 11 : i64} {
  func.func @highway_kernel(%arg0: i32, %arg1: memref<8x128xf32, #tpu.memory_space<vmem>>, %arg2: memref<3x128x256xbf16, #tpu.memory_space<vmem>>, %arg3: memref<3x1x256xf32, #tpu.memory_space<vmem>>, %arg4: memref<8x128xf32, #tpu.memory_space<vmem>>) attributes {dimension_semantics = [#tpu.dimension_semantics<parallel>], iteration_bounds = array<i64: 1>, scalar_prefetch = 0 : i64, scratch_operands = 0 : i64, tpu.core_type = #tpu.core_type<tc>, window_params = [{transform_indices = @transform_0, window_bounds = array<i64: 8, 128>}, {pipeline_mode = #tpu.pipeline_mode<synchronous>, transform_indices = @transform_1, window_bounds = array<i64: 3, 128, 256>}, {pipeline_mode = #tpu.pipeline_mode<synchronous>, transform_indices = @transform_2, window_bounds = array<i64: 3, 1, 256>}, {transform_indices = @transform_3, window_bounds = array<i64: 8, 128>}]} {
    %c0 = arith.constant 0 : index
    %c0_0 = arith.constant 0 : index
    %0 = vector.load %arg1[%c0, %c0_0] : memref<8x128xf32, #tpu.memory_space<vmem>>, vector<8x128xf32>
    %c0_1 = arith.constant 0 : index
    %c0_2 = arith.constant 0 : index
    %c0_3 = arith.constant 0 : index
    %1 = vector.load %arg2[%c0_1, %c0_2, %c0_3] : memref<3x128x256xbf16, #tpu.memory_space<vmem>>, vector<1x128x256xbf16>
    %2 = vector.shape_cast %1 : vector<1x128x256xbf16> to vector<128x256xbf16>
    %c0_4 = arith.constant 0 : index
    %c0_5 = arith.constant 0 : index
    %c0_6 = arith.constant 0 : index
    %3 = vector.load %arg3[%c0_4, %c0_5, %c0_6] : memref<3x1x256xf32, #tpu.memory_space<vmem>>, vector<1x1x256xf32>
    %4 = vector.shape_cast %3 : vector<1x1x256xf32> to vector<1x256xf32>
    %5 = arith.truncf %0 : vector<8x128xf32> to vector<8x128xbf16>
    %cst = arith.constant dense<0.000000e+00> : vector<8x256xf32>
    %6 = tpu.matmul %5, %2, %cst {dimension_numbers = #tpu.dot_dimension_numbers<[1], [0], [0], [1], [0, 0, 1, 1], [], []>} : vector<8x128xbf16>, vector<128x256xbf16>, vector<8x256xf32> -> vector<8x256xf32>
    %7 = vector.broadcast %4 : vector<1x256xf32> to vector<8x256xf32>
    %8 = arith.addf %6, %7 : vector<8x256xf32>
    %9 = vector.extract_strided_slice %8 {offsets = [0, 0], sizes = [8, 128], strides = [1, 1]} : vector<8x256xf32> to vector<8x128xf32>
    %cst_7 = arith.constant 0.000000e+00 : f32
    %10 = vector.broadcast %cst_7 : f32 to vector<8x128xf32>
    %11 = arith.maximumf %9, %10 : vector<8x128xf32>
    %12 = vector.extract_strided_slice %8 {offsets = [0, 128], sizes = [8, 128], strides = [1, 1]} : vector<8x256xf32> to vector<8x128xf32>
    %13 = arith.negf %12 : vector<8x128xf32>
    %14 = math.exp %13 : vector<8x128xf32>
    %cst_8 = arith.constant 1.000000e+00 : f32
    %15 = vector.broadcast %cst_8 : f32 to vector<8x128xf32>
    %16 = arith.addf %15, %14 : vector<8x128xf32>
    %17 = arith.divf %15, %16 : vector<8x128xf32>
    %18 = arith.subf %11, %0 : vector<8x128xf32>
    %19 = arith.mulf %17, %18 : vector<8x128xf32>
    %20 = arith.addf %0, %19 : vector<8x128xf32>
    %c1 = arith.constant 1 : index
    %c0_9 = arith.constant 0 : index
    %c0_10 = arith.constant 0 : index
    %21 = vector.load %arg2[%c1, %c0_9, %c0_10] : memref<3x128x256xbf16, #tpu.memory_space<vmem>>, vector<1x128x256xbf16>
    %22 = vector.shape_cast %21 : vector<1x128x256xbf16> to vector<128x256xbf16>
    %c1_11 = arith.constant 1 : index
    %c0_12 = arith.constant 0 : index
    %c0_13 = arith.constant 0 : index
    %23 = vector.load %arg3[%c1_11, %c0_12, %c0_13] : memref<3x1x256xf32, #tpu.memory_space<vmem>>, vector<1x1x256xf32>
    %24 = vector.shape_cast %23 : vector<1x1x256xf32> to vector<1x256xf32>
    %25 = arith.truncf %20 : vector<8x128xf32> to vector<8x128xbf16>
    %cst_14 = arith.constant dense<0.000000e+00> : vector<8x256xf32>
    %26 = tpu.matmul %25, %22, %cst_14 {dimension_numbers = #tpu.dot_dimension_numbers<[1], [0], [0], [1], [0, 0, 1, 1], [], []>} : vector<8x128xbf16>, vector<128x256xbf16>, vector<8x256xf32> -> vector<8x256xf32>
    %27 = vector.broadcast %24 : vector<1x256xf32> to vector<8x256xf32>
    %28 = arith.addf %26, %27 : vector<8x256xf32>
    %29 = vector.extract_strided_slice %28 {offsets = [0, 0], sizes = [8, 128], strides = [1, 1]} : vector<8x256xf32> to vector<8x128xf32>
    %cst_15 = arith.constant 0.000000e+00 : f32
    %30 = vector.broadcast %cst_15 : f32 to vector<8x128xf32>
    %31 = arith.maximumf %29, %30 : vector<8x128xf32>
    %32 = vector.extract_strided_slice %28 {offsets = [0, 128], sizes = [8, 128], strides = [1, 1]} : vector<8x256xf32> to vector<8x128xf32>
    %33 = arith.negf %32 : vector<8x128xf32>
    %34 = math.exp %33 : vector<8x128xf32>
    %cst_16 = arith.constant 1.000000e+00 : f32
    %35 = vector.broadcast %cst_16 : f32 to vector<8x128xf32>
    %36 = arith.addf %35, %34 : vector<8x128xf32>
    %37 = arith.divf %35, %36 : vector<8x128xf32>
    %38 = arith.subf %31, %20 : vector<8x128xf32>
    %39 = arith.mulf %37, %38 : vector<8x128xf32>
    %40 = arith.addf %20, %39 : vector<8x128xf32>
    %c2 = arith.constant 2 : index
    %c0_17 = arith.constant 0 : index
    %c0_18 = arith.constant 0 : index
    %41 = vector.load %arg2[%c2, %c0_17, %c0_18] : memref<3x128x256xbf16, #tpu.memory_space<vmem>>, vector<1x128x256xbf16>
    %42 = vector.shape_cast %41 : vector<1x128x256xbf16> to vector<128x256xbf16>
    %c2_19 = arith.constant 2 : index
    %c0_20 = arith.constant 0 : index
    %c0_21 = arith.constant 0 : index
    %43 = vector.load %arg3[%c2_19, %c0_20, %c0_21] : memref<3x1x256xf32, #tpu.memory_space<vmem>>, vector<1x1x256xf32>
    %44 = vector.shape_cast %43 : vector<1x1x256xf32> to vector<1x256xf32>
    %45 = arith.truncf %40 : vector<8x128xf32> to vector<8x128xbf16>
    %cst_22 = arith.constant dense<0.000000e+00> : vector<8x256xf32>
    %46 = tpu.matmul %45, %42, %cst_22 {dimension_numbers = #tpu.dot_dimension_numbers<[1], [0], [0], [1], [0, 0, 1, 1], [], []>} : vector<8x128xbf16>, vector<128x256xbf16>, vector<8x256xf32> -> vector<8x256xf32>
    %47 = vector.broadcast %44 : vector<1x256xf32> to vector<8x256xf32>
    %48 = arith.addf %46, %47 : vector<8x256xf32>
    %49 = vector.extract_strided_slice %48 {offsets = [0, 0], sizes = [8, 128], strides = [1, 1]} : vector<8x256xf32> to vector<8x128xf32>
    %cst_23 = arith.constant 0.000000e+00 : f32
    %50 = vector.broadcast %cst_23 : f32 to vector<8x128xf32>
    %51 = arith.maximumf %49, %50 : vector<8x128xf32>
    %52 = vector.extract_strided_slice %48 {offsets = [0, 128], sizes = [8, 128], strides = [1, 1]} : vector<8x256xf32> to vector<8x128xf32>
    %53 = arith.negf %52 : vector<8x128xf32>
    %54 = math.exp %53 : vector<8x128xf32>
    %cst_24 = arith.constant 1.000000e+00 : f32
    %55 = vector.broadcast %cst_24 : f32 to vector<8x128xf32>
    %56 = arith.addf %55, %54 : vector<8x128xf32>
    %57 = arith.divf %55, %56 : vector<8x128xf32>
    %58 = arith.subf %51, %40 : vector<8x128xf32>
    %59 = arith.mulf %57, %58 : vector<8x128xf32>
    %60 = arith.addf %40, %59 : vector<8x128xf32>
    %c0_25 = arith.constant 0 : index
    %c0_26 = arith.constant 0 : index
    %61 = vector.load %arg4[%c0_25, %c0_26] : memref<8x128xf32, #tpu.memory_space<vmem>>, vector<8x128xf32>
    tpu.vector_store %arg4[%c0_25, %c0_26], %60 {strides = array<i32>} : memref<8x128xf32, #tpu.memory_space<vmem>>, vector<8x128xf32>,
    return
  }
  func.func @transform_0(%arg0: i32) -> (i32, i32) {
    %c0_i32 = arith.constant 0 : i32
    %c0_i32_0 = arith.constant 0 : i32
    return %arg0, %c0_i32 : i32, i32
  }
  func.func @transform_1(%arg0: i32) -> (i32, i32, i32) {
    %c0_i32 = arith.constant 0 : i32
    %c0_i32_0 = arith.constant 0 : i32
    %c0_i32_1 = arith.constant 0 : i32
    %c0_i32_2 = arith.constant 0 : i32
    return %c0_i32, %c0_i32_0, %c0_i32_1 : i32, i32, i32
  }
  func.func @transform_2(%arg0: i32) -> (i32, i32, i32) {
    %c0_i32 = arith.constant 0 : i32
    %c0_i32_0 = arith.constant 0 : i32
    %c0_i32_1 = arith.constant 0 : i32
    %c0_i32_2 = arith.constant 0 : i32
    return %c0_i32, %c0_i32_0, %c0_i32_1 : i32, i32, i32
  }
  func.func @transform_3(%arg0: i32) -> (i32, i32) {
    %c0_i32 = arith.constant 0 : i32
    %c0_i32_0 = arith.constant 0 : i32
    return %arg0, %c0_i32 : i32, i32
  }
}

</mosaic_0001>

<bundles_post_ra>
// kernel: highway_layer.1
= control target key start
LH: loop header
LB: loop body
LE: loop exit
PB: predicated region body
PF: predicated region fallthrough
CT: control target
= control target key end

     0   :  { %s1145_s0 = inlined_call_operand.vmem [shape: f32[8,128], index: 0, kind: input, shape index: {}]   ;;  %s1146_s1 = inlined_call_operand.vmem [shape: bf16[3,128,256], index: 1, kind: input, shape index: {}]   ;;  %s1147_s2 = inlined_call_operand.vmem [shape: f32[3,1,256], index: 2, kind: input, shape index: {}]   ;;  %s1148_s3 = inlined_call_operand.hbm [shape: f32[8,128], index: 3, kind: output, shape index: {}]  }
   0x1   :  { %v736_v0 = vld [vmem:[%s1146_s1 + $0x74] sm:$0xf]  ;;  %v553_v1 = vld [vmem:[%s1146_s1 + $0x78] sm:$0xf0]  ;;  %v734_v2 = vld [vmem:[%s1146_s1 + $0x64] sm:$0xf] }
   0x2   :  { %v556_v3 = vor.u32 %v736_v0, %v553_v1  ;;  %v545_v4 = vld [vmem:[%s1146_s1 + $0x68] sm:$0xf0]  ;;  %v551_v5 = vld [vmem:[%s1146_s1 + $0x70] sm:$0xf]  ;;  %v732_v7 = vld [vmem:[%s1146_s1 + $0x54] sm:$0xf] }
   0x3   :  { %v548_v6 = vor.u32 %v734_v2, %v545_v4  ;;  %v737_v8 = vld [vmem:[%s1146_s1 + $0x74] sm:$0xf0]  ;;  %v537_v9 = vld [vmem:[%s1146_s1 + $0x58] sm:$0xf0]  ;;  %v543_v11 = vld [vmem:[%s1146_s1 + $0x60] sm:$0xf] }
   0x4   :  { %132 = vmatpush.bf16.msra.mxu1 %v556_v3  ;;  %v552_v10 = vor.u32 %v737_v8, %v551_v5  ;;  %v735_v12 = vld [vmem:[%s1146_s1 + $0x64] sm:$0xf0]  ;;  %v540_v14 = vor.u32 %v732_v7, %v537_v9  ;;  %v535_v15 = vld [vmem:[%s1146_s1 + $0x50] sm:$0xf]  ;;  %v733_v16 = vld [vmem:[%s1146_s1 + $0x54] sm:$0xf0] }
   0x5   :  { %v544_v13 = vor.u32 %v735_v12, %v543_v11  ;;  %v730_v17 = vld [vmem:[%s1146_s1 + $0x44] sm:$0xf]  ;;  %v529_v18 = vld [vmem:[%s1146_s1 + $0x48] sm:$0xf0]  ;;  %v536_v19 = vor.u32 %v733_v16, %v535_v15  ;;  %v527_v21 = vld [vmem:[%s1146_s1 + $0x40] sm:$0xf] }
   0x6   :  { %119 = vmatpush.bf16.msra.mxu0 %v552_v10  ;;  %v532_v20 = vor.u32 %v730_v17, %v529_v18  ;;  %v731_v22 = vld [vmem:[%s1146_s1 + $0x44] sm:$0xf0] }
   0x8   :  { %133 = vmatpush.bf16.msra.mxu1 %v548_v6 }
   0xa   :  { %120 = vmatpush.bf16.msra.mxu0 %v544_v13 }
   0xc   :  { %134 = vmatpush.bf16.msra.mxu1 %v540_v14 }
   0xd   :  { %8 = vsyncpa [#allocation3], 0  ;;  %v728_v23 = vld [vmem:[%s1146_s1 + $0x34] sm:$0xf]  ;;  %v521_v24 = vld [vmem:[%s1146_s1 + $0x38] sm:$0xf0]  ;;  %v528_v25 = vor.u32 %v731_v22, %v527_v21 }
   0xe   :  { %121 = vmatpush.bf16.msra.mxu0 %v536_v19  ;;  %v524_v26 = vor.u32 %v728_v23, %v521_v24  ;;  %v519_v27 = vld [vmem:[%s1146_s1 + $0x30] sm:$0xf]  ;;  %v729_v28 = vld [vmem:[%s1146_s1 + $0x34] sm:$0xf0]  ;;  %v726_v29 = vld [vmem:[%s1146_s1 + $0x24] sm:$0xf] }
   0xf   :  { %v513_v30 = vld [vmem:[%s1146_s1 + $0x28] sm:$0xf0]  ;;  %v520_v31 = vor.u32 %v729_v28, %v519_v27  ;;  %v511_v33 = vld [vmem:[%s1146_s1 + $0x20] sm:$0xf]  ;;  %v727_v34 = vld [vmem:[%s1146_s1 + $0x24] sm:$0xf0] }
  0x10   :  { %135 = vmatpush.bf16.msra.mxu1 %v532_v20  ;;  %v516_v32 = vor.u32 %v726_v29, %v513_v30  ;;  %v724_v35 = vld [vmem:[%s1146_s1 + $0x14] sm:$0xf]  ;;  %v505_v36 = vld [vmem:[%s1146_s1 + $0x18] sm:$0xf0]  ;;  %v512_v37 = vor.u32 %v727_v34, %v511_v33  ;;  %v503_v39 = vld [vmem:[%s1146_s1 + $0x10] sm:$0xf] }
  0x11   :  { %v508_v38 = vor.u32 %v724_v35, %v505_v36  ;;  %v725_v40 = vld [vmem:[%s1146_s1 + $0x14] sm:$0xf0]  ;;  %v722_v41 = vld [vmem:[%s1146_s1 + $0x4] sm:$0xf]  ;;  %v497_v42 = vld [vmem:[%s1146_s1 + $0x8] sm:$0xf0] }
  0x12   :  { %122 = vmatpush.bf16.msra.mxu0 %v528_v25  ;;  %v504_v43 = vor.u32 %v725_v40, %v503_v39  ;;  %v500_v44 = vor.u32 %v722_v41, %v497_v42  ;;  %v923_v45 = vld [vmem:[%s1145_s0] sm:$0xff]  ;;  %v723_v47 = vld [vmem:[%s1146_s1 + $0x4] sm:$0xf0]  ;;  %v633_v50 = vld [vmem:[%s1146_s1 + $0xf0] sm:$0xf]  ;;  %s484_s20 = sshll.u32 %s1148_s3, 4  ;;  %s485_s20 = int_to_ptr.hbm [resolvable:$true] %s484_s20 }
  0x13   :  { %v495_v46 = vld [vmem:[%s1146_s1] sm:$0xf]  ;;  %v33_v48 = vpack.c.bf16 %v923_v45, %v923_v45  ;;  %v753_v51 = vld [vmem:[%s1146_s1 + $0xf4] sm:$0xf0]  ;;  %v752_v52 = vld [vmem:[%s1146_s1 + $0xf4] sm:$0xf] }
  0x14   :  { %136 = vmatpush.bf16.msra.mxu1 %v524_v26  ;;  %v496_v49 = vor.u32 %v723_v47, %v495_v46  ;;  %v634_v53 = vor.u32 %v753_v51, %v633_v50  ;;  %v635_v54 = vld [vmem:[%s1146_s1 + $0xf8] sm:$0xf0]  ;;  %v625_v56 = vld [vmem:[%s1146_s1 + $0xe0] sm:$0xf]  ;;  %v751_v57 = vld [vmem:[%s1146_s1 + $0xe4] sm:$0xf0] }
  0x15   :  { %v638_v55 = vor.u32 %v752_v52, %v635_v54  ;;  %v750_v58 = vld [vmem:[%s1146_s1 + $0xe4] sm:$0xf]  ;;  %v626_v59 = vor.u32 %v751_v57, %v625_v56  ;;  %v627_v60 = vld [vmem:[%s1146_s1 + $0xe8] sm:$0xf0]  ;;  %v617_v62 = vld [vmem:[%s1146_s1 + $0xd0] sm:$0xf] }
  0x16   :  { %123 = vmatpush.bf16.msra.mxu0 %v520_v31  ;;  %273 = vmatpush.bf16.msra.mxu2 %v634_v53  ;;  %v630_v61 = vor.u32 %v750_v58, %v627_v60  ;;  %v749_v63 = vld [vmem:[%s1146_s1 + $0xd4] sm:$0xf0]  ;;  %v748_v0 = vld [vmem:[%s1146_s1 + $0xd4] sm:$0xf]  ;;  %v619_v2 = vld [vmem:[%s1146_s1 + $0xd8] sm:$0xf0] }
  0x17   :  { %286 = vmatpush.bf16.msra.mxu3 %v638_v55  ;;  %v618_v1 = vor.u32 %v749_v63, %v617_v62  ;;  %v622_v3 = vor.u32 %v748_v0, %v619_v2  ;;  %v609_v4 = vld [vmem:[%s1146_s1 + $0xc0] sm:$0xf]  ;;  %v747_v5 = vld [vmem:[%s1146_s1 + $0xc4] sm:$0xf0]  ;;  %v746_v6 = vld [vmem:[%s1146_s1 + $0xc4] sm:$0xf] }
  0x18   :  { %137 = vmatpush.bf16.msra.mxu1 %v516_v32  ;;  %v610_v7 = vor.u32 %v747_v5, %v609_v4  ;;  %v611_v8 = vld [vmem:[%s1146_s1 + $0xc8] sm:$0xf0]  ;;  %v601_v10 = vld [vmem:[%s1146_s1 + $0xb0] sm:$0xf]  ;;  %v745_v11 = vld [vmem:[%s1146_s1 + $0xb4] sm:$0xf0] }
  0x19   :  { %v614_v9 = vor.u32 %v746_v6, %v611_v8  ;;  %v744_v12 = vld [vmem:[%s1146_s1 + $0xb4] sm:$0xf]  ;;  %v602_v13 = vor.u32 %v745_v11, %v601_v10  ;;  %v603_v14 = vld [vmem:[%s1146_s1 + $0xb8] sm:$0xf0]  ;;  %v593_v16 = vld [vmem:[%s1146_s1 + $0xa0] sm:$0xf] }
  0x1a   :  { %124 = vmatpush.bf16.msra.mxu0 %v512_v37  ;;  %274 = vmatpush.bf16.msra.mxu2 %v626_v59  ;;  %v606_v15 = vor.u32 %v744_v12, %v603_v14  ;;  %v743_v17 = vld [vmem:[%s1146_s1 + $0xa4] sm:$0xf0]  ;;  %v742_v19 = vld [vmem:[%s1146_s1 + $0xa4] sm:$0xf]  ;;  %v595_v20 = vld [vmem:[%s1146_s1 + $0xa8] sm:$0xf0] }
  0x1b   :  { %287 = vmatpush.bf16.msra.mxu3 %v630_v61  ;;  %v594_v18 = vor.u32 %v743_v17, %v593_v16  ;;  %v598_v21 = vor.u32 %v742_v19, %v595_v20  ;;  %v32_v22 = vld [vmem:[%s1147_s2] sm:$0x3]  ;;  %v585_v23 = vld [vmem:[%s1146_s1 + $0x90] sm:$0xf]  ;;  %v741_v24 = vld [vmem:[%s1146_s1 + $0x94] sm:$0xf0] }
  0x1c   :  { %138 = vmatpush.bf16.msra.mxu1 %v508_v38  ;;  %v740_v25 = vld [vmem:[%s1146_s1 + $0x94] sm:$0xf]  ;;  %v586_v26 = vor.u32 %v741_v24, %v585_v23  ;;  %v587_v27 = vld [vmem:[%s1146_s1 + $0x98] sm:$0xf0]  ;;  %v36_v28 = vperm.slane %v32_v22, 1 }
  0x1d   :  { %v590_v29 = vor.u32 %v740_v25, %v587_v27  ;;  %v577_v30 = vld [vmem:[%s1146_s1 + $0x80] sm:$0xf]  ;;  %v739_v31 = vld [vmem:[%s1146_s1 + $0x84] sm:$0xf0]  ;;  %v738_v32 = vld [vmem:[%s1146_s1 + $0x84] sm:$0xf] }
  0x1e   :  { %125 = vmatpush.bf16.msra.mxu0 %v504_v43  ;;  %275 = vmatpush.bf16.msra.mxu2 %v618_v1  ;;  %v578_v34 = vor.u32 %v739_v31, %v577_v30  ;;  %v579_v35 = vld [vmem:[%s1146_s1 + $0x88] sm:$0xf0]  ;;  %v715_v62 = vld [vmem:[%s1146_s1 + $0x170] sm:$0xf]  ;;  %v769_v63 = vld [vmem:[%s1146_s1 + $0x174] sm:$0xf0] }
  0x1f   :  { %288 = vmatpush.bf16.msra.mxu3 %v622_v3  ;;  %v582_v37 = vor.u32 %v738_v32, %v579_v35  ;;  %v768_v0 = vld [vmem:[%s1146_s1 + $0x174] sm:$0xf]  ;;  %v716_v1 = vor.u32 %v769_v63, %v715_v62  ;;  %v707_v3 = vld [vmem:[%s1146_s1 + $0x160] sm:$0xf]  ;;  %v767_v4 = vld [vmem:[%s1146_s1 + $0x164] sm:$0xf0] }
  0x20   :  { %139 = vmatpush.bf16.msra.mxu1 %v500_v44  ;;  %v35_v44 = vperm.slane %v32_v22, 0  ;;  %v766_v5 = vld [vmem:[%s1146_s1 + $0x164] sm:$0xf]  ;;  %v708_v6 = vor.u32 %v767_v4, %v707_v3  ;;  %v765_v10 = vld [vmem:[%s1146_s1 + $0x154] sm:$0xf0] }
  0x21   :  { %v764_v11 = vld [vmem:[%s1146_s1 + $0x154] sm:$0xf]  ;;  %v763_v16 = vld [vmem:[%s1146_s1 + $0x144] sm:$0xf0]  ;;  %v762_v17 = vld [vmem:[%s1146_s1 + $0x144] sm:$0xf] }
  0x22   :  { %126 = vmatpush.bf16.msra.mxu0 %v496_v49  ;;  %276 = vmatpush.bf16.msra.mxu2 %v610_v7  ;;  %v709_v7 = vld [vmem:[%s1146_s1 + $0x168] sm:$0xf0]  ;;  %v761_v22 = vld [vmem:[%s1146_s1 + $0x134] sm:$0xf0]  ;;  %v760_v23 = vld [vmem:[%s1146_s1 + $0x134] sm:$0xf] }
  0x23   :  { %140 = vmatmul.bf16.vlgmr.msra.gmra.mxu1 %v33_v48  ;;  %289 = vmatpush.bf16.msra.mxu3 %v614_v9  ;;  %v712_v8 = vor.u32 %v766_v5, %v709_v7  ;;  %v699_v9 = vld [vmem:[%s1146_s1 + $0x150] sm:$0xf]  ;;  %v693_v19 = vld [vmem:[%s1146_s1 + $0x148] sm:$0xf0]  ;;  %v685_v25 = vld [vmem:[%s1146_s1 + $0x138] sm:$0xf0] }
  0x24   :  { %v700_v12 = vor.u32 %v765_v10, %v699_v9  ;;  %v696_v20 = vor.u32 %v762_v17, %v693_v19  ;;  %v675_v27 = vld [vmem:[%s1146_s1 + $0x120] sm:$0xf]  ;;  %v677_v31 = vld [vmem:[%s1146_s1 + $0x128] sm:$0xf0]  ;;  %v756_v35 = vld [vmem:[%s1146_s1 + $0x114] sm:$0xf] }
  0x25   :  { %127 = vmatmul.bf16.vlgmr.msra.gmra.mxu0 %v33_v48  ;;  %v656_v9 = vld [vmem:[%s1147_s2 + $0x4] sm:$0x3] }
  0x26   :  { %277 = vmatpush.bf16.msra.mxu2 %v602_v13  ;;  %427 = vmatpush.bf16.msrb.mxu0 %v716_v1  ;;  %v701_v13 = vld [vmem:[%s1146_s1 + $0x158] sm:$0xf0]  ;;  %v344_v10 = vperm.slane %v656_v9, 1  ;;  %v343_v19 = vperm.slane %v656_v9, 0 }
  0x27   :  { %290 = vmatpush.bf16.msra.mxu3 %v606_v15  ;;  %v704_v14 = vor.u32 %v764_v11, %v701_v13  ;;  %v691_v15 = vld [vmem:[%s1146_s1 + $0x140] sm:$0xf] }
  0x2a   :  { %278 = vmatpush.bf16.msra.mxu2 %v594_v18  ;;  %428 = vmatpush.bf16.msrb.mxu0 %v708_v6  ;;  %v692_v18 = vor.u32 %v763_v16, %v691_v15 }
  0x2b   :  { %291 = vmatpush.bf16.msra.mxu3 %v598_v21  ;;  %v683_v21 = vld [vmem:[%s1146_s1 + $0x130] sm:$0xf] }
  0x2c   :  { %v684_v24 = vor.u32 %v761_v22, %v683_v21 }
  0x2e   :  { %279 = vmatpush.bf16.msra.mxu2 %v586_v26  ;;  %429 = vmatpush.bf16.msrb.mxu0 %v700_v12  ;;  %v688_v26 = vor.u32 %v760_v23, %v685_v25 }
  0x2f   :  { %292 = vmatpush.bf16.msra.mxu3 %v590_v29  ;;  %v758_v29 = vld [vmem:[%s1146_s1 + $0x124] sm:$0xf] }
  0x30   :  { %v680_v32 = vor.u32 %v758_v29, %v677_v31 }
  0x32   :  { %280 = vmatpush.bf16.msra.mxu2 %v578_v34  ;;  %430 = vmatpush.bf16.msrb.mxu0 %v692_v18  ;;  %v757_v34 = vld [vmem:[%s1146_s1 + $0x114] sm:$0xf0] }
  0x33   :  { %293 = vmatpush.bf16.msra.mxu3 %v582_v37 }
  0x36   :  { %431 = vmatpush.bf16.msrb.mxu0 %v684_v24 }
  0xa0   :  { %v141_v33 = vpop.f32.mrf.mxu1 }
  0xa1   :  { %v142_v36 = vadd.f32 %v141_v33, %v36_v28  ;;  %v759_v28 = vld [vmem:[%s1146_s1 + $0x124] sm:$0xf0]  ;;  %v667_v33 = vld [vmem:[%s1146_s1 + $0x110] sm:$0xf] }
  0xa2   :  { %v128_v39 = vpop.f32.mrf.mxu0  ;;  %v676_v30 = vor.u32 %v759_v28, %v675_v27  ;;  %v668_v37 = vor.u32 %v757_v34, %v667_v33 }
  0xa3   :  { %v557_v38 = vmul.f32 -1.442695, %v142_v36  ;;  %v129_v46 = vadd.f32 %v128_v39, %v35_v44  ;;  %v574_v36 = vld [vmem:[%s1147_s2 + $0x2] sm:$0x3]  ;;  %s809_s2 = smov [#allocation2]  }
  0xa4   :  { %432 = vmatpush.bf16.msrb.mxu0 %v676_v30  ;;  %v190_v44 = vperm.slane %v574_v36, 1  ;;  %s482_s17 = sshll.u32 %s809_s2, 4  ;;  %s483_s17 = int_to_ptr.vmem [resolvable:$true] %s482_s17 }
  0xa5   :  { %771 = vpow2.f32 %v557_v38  ;;  %v145_v50 = vmax.f32 %v129_v46, 0.0  ;;  %v669_v38 = vld [vmem:[%s1146_s1 + $0x118] sm:$0xf0] }
  0xa6   :  { %v672_v39 = vor.u32 %v756_v35, %v669_v38 }
  0xa7   :  { %v165_v55 = vsub.f32 %v145_v50, %v923_v45 }
  0xa8   :  { %v143_v40 = vpop.f32.mrf.mxu1  ;;  %433 = vmatpush.bf16.msrb.mxu0 %v668_v37 }
  0xa9   :  { %v659_v40 = vld [vmem:[%s1146_s1 + $0x100] sm:$0xf] }
  0xaa   :  { %v130_v42 = vpop.f32.mrf.mxu0 }
  0xab   :  { %v772_v41 = vpop.eup %771  ;;  %v754_v42 = vld [vmem:[%s1146_s1 + $0x104] sm:$0xf] }
  0xac   :  { %v149_v43 = vadd.f32 1.0, %v772_v41  ;;  %v755_v41 = vld [vmem:[%s1146_s1 + $0x104] sm:$0xf0] }
  0xad   :  { %v660_v46 = vor.u32 %v755_v41, %v659_v40 }
  0xae   :  { %773 = vrcp.f32 %v149_v43  ;;  %v161_v51 = vand.u32 2147483648, %v149_v43  ;;  %v159_v53 = vand.u32 2147483647, %v149_v43  ;;  %vm155_vm1 = vweird.f32 %v149_v43 }
  0xaf   :  { %434 = vmatpush.bf16.msrb.mxu0 %v660_v46 }
  0xb0   :  { %v162_v56 = vor.u32 1.1754944e-38, %v161_v51  ;;  %vm160_vm3 = vcmp.eq.f32.partialorder %v159_v53, 8.507059e+37 }
  0xb4   :  { %v774_v47 = vpop.eup %773 }
  0xb5   :  { %v151_v48 = vmul.f32 %v774_v47, %v149_v43  ;;  %vm156_vm0 = vweird.f32 %v774_v47  ;;  %v661_v43 = vld [vmem:[%s1146_s1 + $0x108] sm:$0xf0] }
  0xb6   :  { %vm157_vm2 = vmor %vm155_vm1, %vm156_vm0 }
  0xb7   :  { %v152_v49 = vsub.f32 1.0, %v151_v48 }
  0xb9   :  { %v153_v52 = vmul.f32 %v774_v47, %v152_v49 }
  0xbb   :  { %v154_v54 = vadd.f32 %v774_v47, %v153_v52 }
  0xbd   :  { %v158_v57 = vsel %vm157_vm2, %v774_v47, %v154_v54  ;;  %v664_v47 = vor.u32 %v754_v42, %v661_v43 }
  0xbe   :  { %v163_v58 = vsel %vm160_vm3, %v162_v56, %v158_v57  ;;  %v189_v56 = vperm.slane %v574_v36, 0 }
  0xbf   :  { %v166_v59 = vmul.f32 %v165_v55, %v163_v58 }
  0xc1   :  { %v1034_v60 = vadd.f32 %v166_v59, %v923_v45  ;;  %v717_v45 = vld [vmem:[%s1146_s1 + $0x178] sm:$0xf0] }
  0xc2   :  { %v720_v2 = vor.u32 %v768_v0, %v717_v45 }
  0xc3   :  { %v187_v61 = vpack.c.bf16 %v1034_v60, %v1034_v60 }
  0xc4   :  { %440 = vmatpush.bf16.msrb.mxu1 %v720_v2 }
  0xc5   :  { %281 = vmatmul.bf16.vlgmr.msra.gmra.mxu2 %v187_v61  ;;  %294 = vmatmul.bf16.vlgmr.msra.gmra.mxu3 %v187_v61 }
  0xc8   :  { %441 = vmatpush.bf16.msrb.mxu1 %v712_v8 }
  0xcc   :  { %442 = vmatpush.bf16.msrb.mxu1 %v704_v14 }
  0xd0   :  { %443 = vmatpush.bf16.msrb.mxu1 %v696_v20 }
  0xd4   :  { %444 = vmatpush.bf16.msrb.mxu1 %v688_v26 }
  0xd8   :  { %445 = vmatpush.bf16.msrb.mxu1 %v680_v32 }
  0xdc   :  { %446 = vmatpush.bf16.msrb.mxu1 %v672_v39 }
  0xe0   :  { %447 = vmatpush.bf16.msrb.mxu1 %v664_v47 }
 0x148   :  { %v282_v48 = vpop.f32.mrf.mxu2  ;;  %v295_v49 = vpop.f32.mrf.mxu3 }
 0x149   :  { %v296_v50 = vadd.f32 %v295_v49, %v190_v44  ;;  %v283_v58 = vadd.f32 %v282_v48, %v189_v56 }
 0x14b   :  { %v639_v51 = vmul.f32 -1.442695, %v296_v50  ;;  %v299_v63 = vmax.f32 %v283_v58, 0.0 }
 0x14d   :  { %775 = vpow2.f32 %v639_v51  ;;  %v319_v3 = vsub.f32 %v299_v63, %v1034_v60 }
 0x150   :  { %v284_v52 = vpop.f32.mrf.mxu2  ;;  %v297_v53 = vpop.f32.mrf.mxu3 }
 0x153   :  { %v776_v54 = vpop.eup %775 }
 0x154   :  { %v303_v55 = vadd.f32 1.0, %v776_v54 }
 0x156   :  { %777 = vrcp.f32 %v303_v55  ;;  %v315_v62 = vand.u32 2147483648, %v303_v55  ;;  %v313_v1 = vand.u32 2147483647, %v303_v55  ;;  %vm309_vm5 = vweird.f32 %v303_v55 }
 0x158   :  { %v316_v2 = vor.u32 1.1754944e-38, %v315_v62  ;;  %vm314_vm7 = vcmp.eq.f32.partialorder %v313_v1, 8.507059e+37 }
 0x15c   :  { %v778_v57 = vpop.eup %777 }
 0x15d   :  { %v305_v59 = vmul.f32 %v778_v57, %v303_v55  ;;  %vm310_vm4 = vweird.f32 %v778_v57 }
 0x15e   :  { %vm311_vm6 = vmor %vm309_vm5, %vm310_vm4 }
 0x15f   :  { %v306_v61 = vsub.f32 1.0, %v305_v59 }
 0x161   :  { %v307_v0 = vmul.f32 %v778_v57, %v306_v61 }
 0x163   :  { %v308_v45 = vadd.f32 %v778_v57, %v307_v0 }
 0x165   :  { %v312_v4 = vsel %vm311_vm6, %v778_v57, %v308_v45 }
 0x166   :  { %v317_v5 = vsel %vm314_vm7, %v316_v2, %v312_v4 }
 0x167   :  { %v320_v6 = vmul.f32 %v319_v3, %v317_v5 }
 0x169   :  { %v321_v7 = vadd.f32 %v320_v6, %v1034_v60 }
 0x16b   :  { %v341_v8 = vpack.c.bf16 %v321_v7, %v321_v7 }
 0x16d   :  { %435 = vmatmul.bf16.vlgmr.msrb.gmra.mxu0 %v341_v8  ;;  %448 = vmatmul.bf16.vlgmr.msrb.gmra.mxu1 %v341_v8 }
 0x1ea   :  { %v436_v11 = vpop.f32.mrf.mxu0  ;;  %v449_v12 = vpop.f32.mrf.mxu1 }
 0x1eb   :  { %v450_v13 = vadd.f32 %v449_v12, %v344_v10  ;;  %v437_v20 = vadd.f32 %v436_v11, %v343_v19 }
 0x1ed   :  { %v721_v14 = vmul.f32 -1.442695, %v450_v13  ;;  %v453_v24 = vmax.f32 %v437_v20, 0.0 }
 0x1ef   :  { %779 = vpow2.f32 %v721_v14  ;;  %v473_v29 = vsub.f32 %v453_v24, %v321_v7 }
 0x1f2   :  { %v438_v15 = vpop.f32.mrf.mxu0  ;;  %v451_v16 = vpop.f32.mrf.mxu1 }
 0x1f5   :  { %v780_v17 = vpop.eup %779 }
 0x1f6   :  { %v457_v18 = vadd.f32 1.0, %v780_v17 }
 0x1f8   :  { %781 = vrcp.f32 %v457_v18  ;;  %v469_v23 = vand.u32 2147483648, %v457_v18  ;;  %v467_v26 = vand.u32 2147483647, %v457_v18  ;;  %vm463_vm9 = vweird.f32 %v457_v18 }
 0x1fa   :  { %v470_v28 = vor.u32 1.1754944e-38, %v469_v23  ;;  %vm468_vm11 = vcmp.eq.f32.partialorder %v467_v26, 8.507059e+37 }
 0x1fe   :  { %v782_v60 = vpop.eup %781 }
 0x1ff   :  { %v459_v21 = vmul.f32 %v782_v60, %v457_v18  ;;  %vm464_vm8 = vweird.f32 %v782_v60 }
 0x200   :  { %vm465_vm10 = vmor %vm463_vm9, %vm464_vm8 }
 0x201   :  { %v460_v22 = vsub.f32 1.0, %v459_v21 }
 0x203   :  { %v461_v25 = vmul.f32 %v782_v60, %v460_v22 }
 0x205   :  { %v462_v27 = vadd.f32 %v782_v60, %v461_v25 }
 0x207   :  { %v466_v30 = vsel %vm465_vm10, %v782_v60, %v462_v27 }
 0x208   :  { %v471_v31 = vsel %vm468_vm11, %v470_v28, %v466_v30 }
 0x209   :  { %v474_v32 = vmul.f32 %v473_v29, %v471_v31 }
 0x20b   :  { %v475_v33 = vadd.f32 %v474_v32, %v321_v7 }
 0x20d   :  { %476 = vst [vmem:[#allocation2] sm:$0xff] %v475_v33 }
 0x20e   :  { %487 = dma.vmem_to_hbm [thread:$0]  %s483_s17, 128, %s485_s20, [#allocation3]  }
 0x20f   :  { %807 = dma.done.wait [#allocation3], 128  }
 0x210   :  { %808 = vsyncadd [#allocation3], 4294967168 }
 0x211   :  { %492 = vsyncpa [#allocation3], 1 }

</bundles_post_ra>
